<compile_context>
chip_gen: v5e
topology: v5e:2x2
jax: 0.10.0
libtpu: 0.0.40
codegen_flags: <defaults>
</compile_context>

<pallas_src>
import functools
import math

import jax
import jax.numpy as jnp
from jax.experimental import pallas as pl
from jax.experimental.pallas import tpu as pltpu

EPS = 1e-5        # PyTorch BatchNorm2d default
LANE = 128        # TPU lane width; Cout is padded up to a multiple of this


def _round_up(x, m):
    return (x + m - 1) // m * m


def _vmem_limit_bytes():
    # 64 MiB on 128-MiB chips (v5e/v6e), half of physical on v7x (32 MiB),
    # conservative fallback when the capacity cannot be queried.
    try:
        cap = int(getattr(pltpu.get_tpu_info(), "vmem_capacity_bytes"))
        return min(cap // 2, 96 * 1024 * 1024)
    except Exception:
        return 32 * 1024 * 1024


# --------------------------------------------------------------------------
# Pallas kernel: direct conv + BN affine (+ residual) (+ ReLU)
# --------------------------------------------------------------------------
def _conv_bn_kernel(x_ref, w_ref, s_ref, b_ref, *rest,
                    kh, kw, stride, n_pj, tile_ho, wo, relu,
                    has_residual, fold_taps):
    """One (image, Cout-tile, Ho-tile) block.

    x_ref : (n_phase, 1, Hq, Wq, Cin)  phase planes of one padded image
    w_ref : (kh*kw, Cin, tn)           per-tap weight slabs (compute dtype)
    s_ref : (1, tn) folded BN scale    b_ref : (1, tn) folded BN bias
    rest  : [r_ref (1, tile_ho, wo, tn) residual]?,  o_ref (1, tile_ho, wo, tn)
    """
    if has_residual:
        r_ref, o_ref = rest
    else:
        (o_ref,) = rest

    cin = x_ref.shape[-1]
    tn = o_ref.shape[-1]
    rows = tile_ho * wo
    row0 = pl.multiple_of(pl.program_id(2) * tile_ho, tile_ho)

    def tap(ki, kj):
        qi, ri = ki // stride, ki % stride
        qj, rj = kj // stride, kj % stride
        phase = ri * n_pj + rj
        xs = x_ref[phase, 0, pl.ds(row0 + qi, tile_ho), pl.ds(qj, wo), :]
        return xs.reshape(rows, cin)            # free when wo % 8 == 0

    if fold_taps:
        # Fold the kh*kw taps into the contraction dim: one MXU matmul with
        # K = kh*kw*cin; the kh*kw partial sums accumulate inside the MXU.
        patches = jnp.concatenate(
            [tap(ki, kj) for ki in range(kh) for kj in range(kw)], axis=1)
        wk = w_ref[...].reshape(kh * kw * cin, tn)   # free: cin % 128 == 0
        acc = jnp.dot(patches, wk, preferred_element_type=jnp.float32)
    else:
        acc = jnp.zeros((rows, tn), jnp.float32)
        for ki in range(kh):
            for kj in range(kw):
                acc = acc + jnp.dot(tap(ki, kj), w_ref[ki * kw + kj],
                                    preferred_element_type=jnp.float32)

    y = acc * s_ref[...] + b_ref[...]               # (rows,tn) * (1,tn) f32
    if has_residual:
        y = y + r_ref[0].reshape(rows, tn).astype(jnp.float32)
    if relu:
        y = jnp.maximum(y, 0.0)
    o_ref[0] = y.reshape(tile_ho, wo, tn).astype(o_ref.dtype)


# --------------------------------------------------------------------------
# Wrapper: phase decomposition + lane-dense padding + tiled pallas_call
# --------------------------------------------------------------------------
def conv_bn(x_nhwc, w_oihw, scale, bias, *, stride, pad, relu,
            residual=None, out_dtype=jnp.float32, compute_dtype=jnp.bfloat16):
    """Fused conv2d(bias=False) + folded-BN affine (+ residual add) (+ ReLU).

    Returns a 4-D (N, Ho, Wo, Cout_padded) tensor in `out_dtype`; channels
    beyond Cout are exactly zero.  `residual` (if given) must already be
    (N, Ho, Wo, Cout_padded).
    """
    n, h, w, cin_x = x_nhwc.shape
    cout, cin_w, kh, kw = w_oihw.shape
    if cin_w < cin_x:                 # x may carry zero-padded channels
        w_oihw = jnp.pad(w_oihw, ((0, 0), (0, cin_x - cin_w), (0, 0), (0, 0)))
    coutp = _round_up(cout, LANE)
    tn = 256 if coutp % 256 == 0 else LANE
    fold_taps = (cin_x % LANE == 0)   # lane-aligned concat along K is cheap/safe

    ho = (h + 2 * pad - kh) // stride + 1
    wo = (w + 2 * pad - kw) // stride + 1
    max_qi = (kh - 1) // stride
    max_qj = (kw - 1) // stride
    n_pi, n_pj = min(stride, kh), min(stride, kw)   # phases actually read

    # Spatial M tile: ~512 output pixels per grid step.
    tile_ho = max(1, min(ho, 512 // max(wo, 1)))
    n_mh = -(-ho // tile_ho)

    # Padded extent must cover the conv padding AND every row/col the kernel
    # touches (including the ragged last Ho tile).
    hp = _round_up(max(h + 2 * pad, stride * (n_mh * tile_ho + max_qi)), stride)
    wp = _round_up(max(w + 2 * pad, stride * (wo + max_qj)), stride)
    hq, wq = hp // stride, wp // stride

    # --- phase decomposition of the padded input (plain JAX, ~1x traffic) ---
    xp = jnp.pad(x_nhwc.astype(compute_dtype),
                 ((0, 0), (pad, hp - h - pad), (pad, wp - w - pad), (0, 0)))
    phases = xp.reshape(n, hq, stride, wq, stride, cin_x)
    phases = jnp.transpose(phases, (2, 4, 0, 1, 3, 5))[:n_pi, :n_pj]
    phases = phases.reshape(n_pi * n_pj, n, hq, wq, cin_x)

    # --- weights / folded BN params, padded lane-dense ----------------------
    wm = jnp.transpose(w_oihw, (2, 3, 1, 0)).reshape(kh * kw, cin_x, cout)
    wm = jnp.pad(wm, ((0, 0), (0, 0), (0, coutp - cout))).astype(compute_dtype)
    sc = jnp.pad(scale.astype(jnp.float32), (0, coutp - cout)).reshape(1, coutp)
    bi = jnp.pad(bias.astype(jnp.float32), (0, coutp - cout)).reshape(1, coutp)

    grid = (n, coutp // tn, n_mh)
    in_specs = [
        pl.BlockSpec((n_pi * n_pj, 1, hq, wq, cin_x),
                     lambda b, j, mh: (0, b, 0, 0, 0)),
        pl.BlockSpec((kh * kw, cin_x, tn), lambda b, j, mh: (0, 0, j)),
        pl.BlockSpec((1, tn), lambda b, j, mh: (0, j)),
        pl.BlockSpec((1, tn), lambda b, j, mh: (0, j)),
    ]
    args = [phases, wm, sc, bi]
    if residual is not None:
        assert residual.shape == (n, ho, wo, coutp), residual.shape
        in_specs.append(pl.BlockSpec((1, tile_ho, wo, tn),
                                     lambda b, j, mh: (b, mh, 0, j)))
        args.append(residual)

    flops = 2 * n * ho * wo * (kh * kw * cin_x) * coutp
    bytes_accessed = sum(int(math.prod(a.shape)) * a.dtype.itemsize for a in args)
    bytes_accessed += n * ho * wo * coutp * jnp.dtype(out_dtype).itemsize

    kernel = functools.partial(
        _conv_bn_kernel, kh=kh, kw=kw, stride=stride, n_pj=n_pj,
        tile_ho=tile_ho, wo=wo, relu=relu,
        has_residual=residual is not None, fold_taps=fold_taps)

    return pl.pallas_call(
        kernel,
        out_shape=jax.ShapeDtypeStruct((n, ho, wo, coutp), out_dtype),
        grid=grid,
        in_specs=in_specs,
        out_specs=pl.BlockSpec((1, tile_ho, wo, tn),
                               lambda b, j, mh: (b, mh, 0, j)),
        compiler_params=pltpu.CompilerParams(
            dimension_semantics=("parallel", "parallel", "parallel"),
            vmem_limit_bytes=_vmem_limit_bytes()),
        cost_estimate=pl.CostEstimate(flops=flops, transcendentals=0,
                                      bytes_accessed=bytes_accessed),
    )(*args)


def fold_bn(gamma, beta, mean, var):
    scale = gamma / jnp.sqrt(var + EPS)
    bias = beta - mean * scale
    return scale, bias


# --------------------------------------------------------------------------
# ResidualBlock forward (NCHW in / NCHW out, matching the PyTorch module)
# --------------------------------------------------------------------------
def residual_block(x_nchw, params, stride, compute_dtype=jnp.bfloat16):
    x = jnp.transpose(x_nchw, (0, 2, 3, 1))              # NHWC
    n, h, w, cin = x.shape
    cout = params["w1"].shape[0]
    coutp = _round_up(cout, LANE)

    # left: conv3x3(stride) + BN + ReLU   (y1 stays NHWC, lane-padded, bf16)
    s1, b1 = fold_bn(params["g1"], params["b1"], params["m1"], params["v1"])
    y1 = conv_bn(x, params["w1"], s1, b1, stride=stride, pad=1, relu=True,
                 out_dtype=compute_dtype, compute_dtype=compute_dtype)

    # shortcut branch (bf16 residual stream)
    if stride != 1 or cin != cout:
        ss, bs = fold_bn(params["gs"], params["bs"], params["ms"], params["vs"])
        res = conv_bn(x, params["ws"], ss, bs, stride=stride, pad=0, relu=False,
                      out_dtype=compute_dtype, compute_dtype=compute_dtype)
    else:
        # identity shortcut: lane-pad channels (zeros), stored bf16.
        res = jnp.pad(x.astype(compute_dtype),
                      ((0, 0), (0, 0), (0, 0), (0, coutp - cin)))

    # left: conv3x3(1) + BN, fused with residual add + final ReLU (f32 out)
    s2, b2 = fold_bn(params["g2"], params["b2"], params["m2"], params["v2"])
    out = conv_bn(y1, params["w2"], s2, b2, stride=1, pad=1, relu=True,
                  residual=res, out_dtype=jnp.float32,
                  compute_dtype=compute_dtype)
    out = out[:, :, :, :cout]
    return jnp.transpose(out, (0, 3, 1, 2))               # back to NCHW


# --------------------------------------------------------------------------
# Pure-JAX reference (for correctness check)
# --------------------------------------------------------------------------
def ref_residual_block(x, params, stride, identity_shortcut):
    def conv(xx, w, s, p):
        return jax.lax.conv_general_dilated(
            xx, w, (s, s), [(p, p), (p, p)],
            dimension_numbers=("NCHW", "OIHW", "NCHW"),
            precision=jax.lax.Precision.HIGHEST)

    def bn(xx, g, b, m, v):
        g, b, m, v = [a[None, :, None, None] for a in (g, b, m, v)]
        return (xx - m) / jnp.sqrt(v + EPS) * g + b

    out = jax.nn.relu(bn(conv(x, params["w1"], stride, 1),
                         params["g1"], params["b1"], params["m1"], params["v1"]))
    out = bn(conv(out, params["w2"], 1, 1),
             params["g2"], params["b2"], params["m2"], params["v2"])
    if identity_shortcut:
        sc = x
    else:
        sc = bn(conv(x, params["ws"], stride, 0),
                params["gs"], params["bs"], params["ms"], params["vs"])
    return jax.nn.relu(out + sc)


# --------------------------------------------------------------------------
# Deterministic parameter construction + run
# --------------------------------------------------------------------------
def make_params(key, cin, cout):
    ks = jax.random.split(key, 6)
    f32 = jnp.float32

    def bn_params(k):
        k1, k2, k3, k4 = jax.random.split(k, 4)
        gamma = 1.0 + 0.1 * jax.random.normal(k1, (cout,), f32)
        beta = 0.1 * jax.random.normal(k2, (cout,), f32)
        mean = 0.1 * jax.random.normal(k3, (cout,), f32)
        var = 0.5 + 0.5 * jnp.abs(jax.random.normal(k4, (cout,), f32))
        return gamma, beta, mean, var

    g1, b1, m1, v1 = bn_params(ks[1])
    g2, b2, m2, v2 = bn_params(ks[3])
    gs, bs, ms, vs = bn_params(ks[5])
    return {
        "w1": 0.1 * jax.random.normal(ks[0], (cout, cin, 3, 3), f32),
        "g1": g1, "b1": b1, "m1": m1, "v1": v1,
        "w2": 0.1 * jax.random.normal(ks[2], (cout, cout, 3, 3), f32),
        "g2": g2, "b2": b2, "m2": m2, "v2": v2,
        "ws": 0.1 * jax.random.normal(ks[4], (cout, cin, 1, 1), f32),
        "gs": gs, "bs": bs, "ms": ms, "vs": vs,
    }


def run_case(key, inchannel, outchannel, stride, spatial=16):
    kx, kp = jax.random.split(key)
    x = jax.random.normal(kx, (2, inchannel, spatial, spatial), jnp.float32)
    params = make_params(kp, inchannel, outchannel)
    identity = (stride == 1 and inchannel == outchannel)

    ref = jax.block_until_ready(ref_residual_block(x, params, stride, identity))

    # f32-operand path: checks semantics at tight tolerance.
    out_f32 = jax.block_until_ready(
        residual_block(x, params, stride, compute_dtype=jnp.float32))
    assert out_f32.shape == ref.shape, (out_f32.shape, ref.shape)
    assert jnp.allclose(out_f32, ref, atol=1e-3, rtol=1e-3), \
        f"f32 max abs err {jnp.max(jnp.abs(out_f32 - ref))}"

    # bf16 streaming path (the performance configuration).
    out_bf16 = jax.block_until_ready(
        residual_block(x, params, stride, compute_dtype=jnp.bfloat16))
    assert out_bf16.shape == ref.shape
    assert jnp.allclose(out_bf16, ref, atol=5e-2, rtol=5e-2), \
        f"bf16 max abs err {jnp.max(jnp.abs(out_bf16 - ref))}"


if __name__ == "__main__":
    key = jax.random.PRNGKey(0)
    k1, k2 = jax.random.split(key)
    run_case(k1, 4, 8, 2)      # downsampling block (conv shortcut branch)
    run_case(k2, 8, 8, 1)      # identity-shortcut block (stride 1, cin == cout)
    print("KERNEL_OK")
</pallas_src>

<mosaic_0001>
module attributes {stable_mosaic.version = 11 : i64} {
  func.func @_conv_bn_kernel(%arg0: i32, %arg1: i32, %arg2: i32, %arg3: memref<4x1x9x9x4xf32, #tpu.memory_space<vmem>>, %arg4: memref<9x4x128xf32, #tpu.memory_space<vmem>>, %arg5: memref<1x128xf32, #tpu.memory_space<vmem>>, %arg6: memref<1x128xf32, #tpu.memory_space<vmem>>, %arg7: memref<1x8x8x128xf32, #tpu.memory_space<vmem>>) attributes {dimension_semantics = [#tpu.dimension_semantics<parallel>, #tpu.dimension_semantics<parallel>, #tpu.dimension_semantics<parallel>], iteration_bounds = array<i64: 2, 1, 1>, scalar_prefetch = 0 : i64, scratch_operands = 0 : i64, tpu.core_type = #tpu.core_type<tc>, window_params = [{transform_indices = @transform_0, window_bounds = array<i64: 4, 1, 9, 9, 4>}, {transform_indices = @transform_1, window_bounds = array<i64: 9, 4, 128>}, {transform_indices = @transform_2, window_bounds = array<i64: 1, 128>}, {transform_indices = @transform_3, window_bounds = array<i64: 1, 128>}, {transform_indices = @transform_4, window_bounds = array<i64: 1, 8, 8, 128>}]} {
    %c8_i32 = arith.constant 8 : i32
    %0 = arith.muli %arg2, %c8_i32 : i32
    %1 = tpu.assume_multiple %0, 8 : i32
    %cst = arith.constant 0.000000e+00 : f32
    %2 = vector.broadcast %cst : f32 to vector<64x128xf32>
    %c0_i32 = arith.constant 0 : i32
    %3 = arith.addi %1, %c0_i32 : i32
    %c0 = arith.constant 0 : index
    %c0_0 = arith.constant 0 : index
    %4 = arith.index_cast %3 : i32 to index
    %c0_1 = arith.constant 0 : index
    %c0_2 = arith.constant 0 : index
    %5 = vector.load %arg3[%c0, %c0_0, %4, %c0_1, %c0_2] : memref<4x1x9x9x4xf32, #tpu.memory_space<vmem>>, vector<1x1x8x8x4xf32>
    %6 = vector.shape_cast %5 : vector<1x1x8x8x4xf32> to vector<8x8x4xf32>
    %7 = vector.shape_cast %6 : vector<8x8x4xf32> to vector<64x4xf32>
    %c0_3 = arith.constant 0 : index
    %c0_4 = arith.constant 0 : index
    %c0_5 = arith.constant 0 : index
    %8 = vector.load %arg4[%c0_3, %c0_4, %c0_5] : memref<9x4x128xf32, #tpu.memory_space<vmem>>, vector<1x4x128xf32>
    %9 = vector.shape_cast %8 : vector<1x4x128xf32> to vector<4x128xf32>
    %cst_6 = arith.constant dense<0.000000e+00> : vector<64x128xf32>
    %10 = tpu.matmul %7, %9, %cst_6 {dimension_numbers = #tpu.dot_dimension_numbers<[1], [0], [0], [1], [0, 0, 1, 1], [], []>} : vector<64x4xf32>, vector<4x128xf32>, vector<64x128xf32> -> vector<64x128xf32>
    %11 = arith.addf %2, %10 : vector<64x128xf32>
    %c0_i32_7 = arith.constant 0 : i32
    %12 = arith.addi %1, %c0_i32_7 : i32
    %c1 = arith.constant 1 : index
    %c0_8 = arith.constant 0 : index
    %13 = arith.index_cast %12 : i32 to index
    %c0_9 = arith.constant 0 : index
    %c0_10 = arith.constant 0 : index
    %14 = vector.load %arg3[%c1, %c0_8, %13, %c0_9, %c0_10] : memref<4x1x9x9x4xf32, #tpu.memory_space<vmem>>, vector<1x1x8x8x4xf32>
    %15 = vector.shape_cast %14 : vector<1x1x8x8x4xf32> to vector<8x8x4xf32>
    %16 = vector.shape_cast %15 : vector<8x8x4xf32> to vector<64x4xf32>
    %c1_11 = arith.constant 1 : index
    %c0_12 = arith.constant 0 : index
    %c0_13 = arith.constant 0 : index
    %17 = vector.load %arg4[%c1_11, %c0_12, %c0_13] : memref<9x4x128xf32, #tpu.memory_space<vmem>>, vector<1x4x128xf32>
    %18 = vector.shape_cast %17 : vector<1x4x128xf32> to vector<4x128xf32>
    %cst_14 = arith.constant dense<0.000000e+00> : vector<64x128xf32>
    %19 = tpu.matmul %16, %18, %cst_14 {dimension_numbers = #tpu.dot_dimension_numbers<[1], [0], [0], [1], [0, 0, 1, 1], [], []>} : vector<64x4xf32>, vector<4x128xf32>, vector<64x128xf32> -> vector<64x128xf32>
    %20 = arith.addf %11, %19 : vector<64x128xf32>
    %c0_i32_15 = arith.constant 0 : i32
    %21 = arith.addi %1, %c0_i32_15 : i32
    %c0_16 = arith.constant 0 : index
    %c0_17 = arith.constant 0 : index
    %22 = arith.index_cast %21 : i32 to index
    %c1_18 = arith.constant 1 : index
    %c0_19 = arith.constant 0 : index
    %23 = vector.load %arg3[%c0_16, %c0_17, %22, %c1_18, %c0_19] : memref<4x1x9x9x4xf32, #tpu.memory_space<vmem>>, vector<1x1x8x8x4xf32>
    %24 = vector.shape_cast %23 : vector<1x1x8x8x4xf32> to vector<8x8x4xf32>
    %25 = vector.shape_cast %24 : vector<8x8x4xf32> to vector<64x4xf32>
    %c2 = arith.constant 2 : index
    %c0_20 = arith.constant 0 : index
    %c0_21 = arith.constant 0 : index
    %26 = vector.load %arg4[%c2, %c0_20, %c0_21] : memref<9x4x128xf32, #tpu.memory_space<vmem>>, vector<1x4x128xf32>
    %27 = vector.shape_cast %26 : vector<1x4x128xf32> to vector<4x128xf32>
    %cst_22 = arith.constant dense<0.000000e+00> : vector<64x128xf32>
    %28 = tpu.matmul %25, %27, %cst_22 {dimension_numbers = #tpu.dot_dimension_numbers<[1], [0], [0], [1], [0, 0, 1, 1], [], []>} : vector<64x4xf32>, vector<4x128xf32>, vector<64x128xf32> -> vector<64x128xf32>
    %29 = arith.addf %20, %28 : vector<64x128xf32>
    %c0_i32_23 = arith.constant 0 : i32
    %30 = arith.addi %1, %c0_i32_23 : i32
    %c2_24 = arith.constant 2 : index
    %c0_25 = arith.constant 0 : index
    %31 = arith.index_cast %30 : i32 to index
    %c0_26 = arith.constant 0 : index
    %c0_27 = arith.constant 0 : index
    %32 = vector.load %arg3[%c2_24, %c0_25, %31, %c0_26, %c0_27] : memref<4x1x9x9x4xf32, #tpu.memory_space<vmem>>, vector<1x1x8x8x4xf32>
    %33 = vector.shape_cast %32 : vector<1x1x8x8x4xf32> to vector<8x8x4xf32>
    %34 = vector.shape_cast %33 : vector<8x8x4xf32> to vector<64x4xf32>
    %c3 = arith.constant 3 : index
    %c0_28 = arith.constant 0 : index
    %c0_29 = arith.constant 0 : index
    %35 = vector.load %arg4[%c3, %c0_28, %c0_29] : memref<9x4x128xf32, #tpu.memory_space<vmem>>, vector<1x4x128xf32>
    %36 = vector.shape_cast %35 : vector<1x4x128xf32> to vector<4x128xf32>
    %cst_30 = arith.constant dense<0.000000e+00> : vector<64x128xf32>
    %37 = tpu.matmul %34, %36, %cst_30 {dimension_numbers = #tpu.dot_dimension_numbers<[1], [0], [0], [1], [0, 0, 1, 1], [], []>} : vector<64x4xf32>, vector<4x128xf32>, vector<64x128xf32> -> vector<64x128xf32>
    %38 = arith.addf %29, %37 : vector<64x128xf32>
    %c0_i32_31 = arith.constant 0 : i32
    %39 = arith.addi %1, %c0_i32_31 : i32
    %c3_32 = arith.constant 3 : index
    %c0_33 = arith.constant 0 : index
    %40 = arith.index_cast %39 : i32 to index
    %c0_34 = arith.constant 0 : index
    %c0_35 = arith.constant 0 : index
    %41 = vector.load %arg3[%c3_32, %c0_33, %40, %c0_34, %c0_35] : memref<4x1x9x9x4xf32, #tpu.memory_space<vmem>>, vector<1x1x8x8x4xf32>
    %42 = vector.shape_cast %41 : vector<1x1x8x8x4xf32> to vector<8x8x4xf32>
    %43 = vector.shape_cast %42 : vector<8x8x4xf32> to vector<64x4xf32>
    %c4 = arith.constant 4 : index
    %c0_36 = arith.constant 0 : index
    %c0_37 = arith.constant 0 : index
    %44 = vector.load %arg4[%c4, %c0_36, %c0_37] : memref<9x4x128xf32, #tpu.memory_space<vmem>>, vector<1x4x128xf32>
    %45 = vector.shape_cast %44 : vector<1x4x128xf32> to vector<4x128xf32>
    %cst_38 = arith.constant dense<0.000000e+00> : vector<64x128xf32>
    %46 = tpu.matmul %43, %45, %cst_38 {dimension_numbers = #tpu.dot_dimension_numbers<[1], [0], [0], [1], [0, 0, 1, 1], [], []>} : vector<64x4xf32>, vector<4x128xf32>, vector<64x128xf32> -> vector<64x128xf32>
    %47 = arith.addf %38, %46 : vector<64x128xf32>
    %c0_i32_39 = arith.constant 0 : i32
    %48 = arith.addi %1, %c0_i32_39 : i32
    %c2_40 = arith.constant 2 : index
    %c0_41 = arith.constant 0 : index
    %49 = arith.index_cast %48 : i32 to index
    %c1_42 = arith.constant 1 : index
    %c0_43 = arith.constant 0 : index
    %50 = vector.load %arg3[%c2_40, %c0_41, %49, %c1_42, %c0_43] : memref<4x1x9x9x4xf32, #tpu.memory_space<vmem>>, vector<1x1x8x8x4xf32>
    %51 = vector.shape_cast %50 : vector<1x1x8x8x4xf32> to vector<8x8x4xf32>
    %52 = vector.shape_cast %51 : vector<8x8x4xf32> to vector<64x4xf32>
    %c5 = arith.constant 5 : index
    %c0_44 = arith.constant 0 : index
    %c0_45 = arith.constant 0 : index
    %53 = vector.load %arg4[%c5, %c0_44, %c0_45] : memref<9x4x128xf32, #tpu.memory_space<vmem>>, vector<1x4x128xf32>
    %54 = vector.shape_cast %53 : vector<1x4x128xf32> to vector<4x128xf32>
    %cst_46 = arith.constant dense<0.000000e+00> : vector<64x128xf32>
    %55 = tpu.matmul %52, %54, %cst_46 {dimension_numbers = #tpu.dot_dimension_numbers<[1], [0], [0], [1], [0, 0, 1, 1], [], []>} : vector<64x4xf32>, vector<4x128xf32>, vector<64x128xf32> -> vector<64x128xf32>
    %56 = arith.addf %47, %55 : vector<64x128xf32>
    %c1_i32 = arith.constant 1 : i32
    %57 = arith.addi %1, %c1_i32 : i32
    %c0_47 = arith.constant 0 : index
    %c0_48 = arith.constant 0 : index
    %58 = arith.index_cast %57 : i32 to index
    %c0_49 = arith.constant 0 : index
    %c0_50 = arith.constant 0 : index
    %59 = vector.load %arg3[%c0_47, %c0_48, %58, %c0_49, %c0_50] : memref<4x1x9x9x4xf32, #tpu.memory_space<vmem>>, vector<1x1x8x8x4xf32>
    %60 = vector.shape_cast %59 : vector<1x1x8x8x4xf32> to vector<8x8x4xf32>
    %61 = vector.shape_cast %60 : vector<8x8x4xf32> to vector<64x4xf32>
    %c6 = arith.constant 6 : index
    %c0_51 = arith.constant 0 : index
    %c0_52 = arith.constant 0 : index
    %62 = vector.load %arg4[%c6, %c0_51, %c0_52] : memref<9x4x128xf32, #tpu.memory_space<vmem>>, vector<1x4x128xf32>
    %63 = vector.shape_cast %62 : vector<1x4x128xf32> to vector<4x128xf32>
    %cst_53 = arith.constant dense<0.000000e+00> : vector<64x128xf32>
    %64 = tpu.matmul %61, %63, %cst_53 {dimension_numbers = #tpu.dot_dimension_numbers<[1], [0], [0], [1], [0, 0, 1, 1], [], []>} : vector<64x4xf32>, vector<4x128xf32>, vector<64x128xf32> -> vector<64x128xf32>
    %65 = arith.addf %56, %64 : vector<64x128xf32>
    %c1_i32_54 = arith.constant 1 : i32
    %66 = arith.addi %1, %c1_i32_54 : i32
    %c1_55 = arith.constant 1 : index
    %c0_56 = arith.constant 0 : index
    %67 = arith.index_cast %66 : i32 to index
    %c0_57 = arith.constant 0 : index
    %c0_58 = arith.constant 0 : index
    %68 = vector.load %arg3[%c1_55, %c0_56, %67, %c0_57, %c0_58] : memref<4x1x9x9x4xf32, #tpu.memory_space<vmem>>, vector<1x1x8x8x4xf32>
    %69 = vector.shape_cast %68 : vector<1x1x8x8x4xf32> to vector<8x8x4xf32>
    %70 = vector.shape_cast %69 : vector<8x8x4xf32> to vector<64x4xf32>
    %c7 = arith.constant 7 : index
    %c0_59 = arith.constant 0 : index
    %c0_60 = arith.constant 0 : index
    %71 = vector.load %arg4[%c7, %c0_59, %c0_60] : memref<9x4x128xf32, #tpu.memory_space<vmem>>, vector<1x4x128xf32>
    %72 = vector.shape_cast %71 : vector<1x4x128xf32> to vector<4x128xf32>
    %cst_61 = arith.constant dense<0.000000e+00> : vector<64x128xf32>
    %73 = tpu.matmul %70, %72, %cst_61 {dimension_numbers = #tpu.dot_dimension_numbers<[1], [0], [0], [1], [0, 0, 1, 1], [], []>} : vector<64x4xf32>, vector<4x128xf32>, vector<64x128xf32> -> vector<64x128xf32>
    %74 = arith.addf %65, %73 : vector<64x128xf32>
    %c1_i32_62 = arith.constant 1 : i32
    %75 = arith.addi %1, %c1_i32_62 : i32
    %c0_63 = arith.constant 0 : index
    %c0_64 = arith.constant 0 : index
    %76 = arith.index_cast %75 : i32 to index
    %c1_65 = arith.constant 1 : index
    %c0_66 = arith.constant 0 : index
    %77 = vector.load %arg3[%c0_63, %c0_64, %76, %c1_65, %c0_66] : memref<4x1x9x9x4xf32, #tpu.memory_space<vmem>>, vector<1x1x8x8x4xf32>
    %78 = vector.shape_cast %77 : vector<1x1x8x8x4xf32> to vector<8x8x4xf32>
    %79 = vector.shape_cast %78 : vector<8x8x4xf32> to vector<64x4xf32>
    %c8 = arith.constant 8 : index
    %c0_67 = arith.constant 0 : index
    %c0_68 = arith.constant 0 : index
    %80 = vector.load %arg4[%c8, %c0_67, %c0_68] : memref<9x4x128xf32, #tpu.memory_space<vmem>>, vector<1x4x128xf32>
    %81 = vector.shape_cast %80 : vector<1x4x128xf32> to vector<4x128xf32>
    %cst_69 = arith.constant dense<0.000000e+00> : vector<64x128xf32>
    %82 = tpu.matmul %79, %81, %cst_69 {dimension_numbers = #tpu.dot_dimension_numbers<[1], [0], [0], [1], [0, 0, 1, 1], [], []>} : vector<64x4xf32>, vector<4x128xf32>, vector<64x128xf32> -> vector<64x128xf32>
    %83 = arith.addf %74, %82 : vector<64x128xf32>
    %c0_70 = arith.constant 0 : index
    %c0_71 = arith.constant 0 : index
    %84 = vector.load %arg5[%c0_70, %c0_71] : memref<1x128xf32, #tpu.memory_space<vmem>>, vector<1x128xf32>
    %85 = vector.broadcast %84 : vector<1x128xf32> to vector<64x128xf32>
    %86 = arith.mulf %83, %85 : vector<64x128xf32>
    %c0_72 = arith.constant 0 : index
    %c0_73 = arith.constant 0 : index
    %87 = vector.load %arg6[%c0_72, %c0_73] : memref<1x128xf32, #tpu.memory_space<vmem>>, vector<1x128xf32>
    %88 = vector.broadcast %87 : vector<1x128xf32> to vector<64x128xf32>
    %89 = arith.addf %86, %88 : vector<64x128xf32>
    %cst_74 = arith.constant 0.000000e+00 : f32
    %90 = vector.broadcast %cst_74 : f32 to vector<64x128xf32>
    %91 = arith.maximumf %89, %90 : vector<64x128xf32>
    %92 = vector.shape_cast %91 : vector<64x128xf32> to vector<8x8x128xf32>
    %c0_75 = arith.constant 0 : index
    %c0_76 = arith.constant 0 : index
    %c0_77 = arith.constant 0 : index
    %c0_78 = arith.constant 0 : index
    %93 = vector.load %arg7[%c0_75, %c0_76, %c0_77, %c0_78] : memref<1x8x8x128xf32, #tpu.memory_space<vmem>>, vector<1x8x8x128xf32>
    %94 = vector.shape_cast %93 : vector<1x8x8x128xf32> to vector<8x8x128xf32>
    %95 = vector.shape_cast %92 : vector<8x8x128xf32> to vector<1x8x8x128xf32>
    tpu.vector_store %arg7[%c0_75, %c0_76, %c0_77, %c0_78], %95 {strides = array<i32>} : memref<1x8x8x128xf32, #tpu.memory_space<vmem>>, vector<1x8x8x128xf32>,
    return
  }
  func.func @transform_0(%arg0: i32, %arg1: i32, %arg2: i32) -> (i32, i32, i32, i32, i32) {
    %c0_i32 = arith.constant 0 : i32
    %c0_i32_0 = arith.constant 0 : i32
    %c0_i32_1 = arith.constant 0 : i32
    %c0_i32_2 = arith.constant 0 : i32
    %c0_i32_3 = arith.constant 0 : i32
    return %c0_i32, %arg0, %c0_i32_0, %c0_i32_1, %c0_i32_2 : i32, i32, i32, i32, i32
  }
  func.func @transform_1(%arg0: i32, %arg1: i32, %arg2: i32) -> (i32, i32, i32) {
    %c0_i32 = arith.constant 0 : i32
    %c0_i32_0 = arith.constant 0 : i32
    %c0_i32_1 = arith.constant 0 : i32
    return %c0_i32, %c0_i32_0, %arg1 : i32, i32, i32
  }
  func.func @transform_2(%arg0: i32, %arg1: i32, %arg2: i32) -> (i32, i32) {
    %c0_i32 = arith.constant 0 : i32
    %c0_i32_0 = arith.constant 0 : i32
    return %c0_i32, %arg1 : i32, i32
  }
  func.func @transform_3(%arg0: i32, %arg1: i32, %arg2: i32) -> (i32, i32) {
    %c0_i32 = arith.constant 0 : i32
    %c0_i32_0 = arith.constant 0 : i32
    return %c0_i32, %arg1 : i32, i32
  }
  func.func @transform_4(%arg0: i32, %arg1: i32, %arg2: i32) -> (i32, i32, i32, i32) {
    %c0_i32 = arith.constant 0 : i32
    %c0_i32_0 = arith.constant 0 : i32
    return %arg0, %arg2, %c0_i32, %arg1 : i32, i32, i32, i32
  }
}

</mosaic_0001>

<bundles_post_ra>
// kernel: tpu_custom_call.1
= control target key start
LH: loop header
LB: loop body
LE: loop exit
PB: predicated region body
PF: predicated region fallthrough
CT: control target
= control target key end

     0   :  { %9 = vsyncpa [#allocation4], 0  ;;  %s2444_s0 = inlined_call_operand.vmem [shape: f32[4,2,9,9,4], index: 0, kind: input, shape index: {}]   ;;  %s2445_s1 = inlined_call_operand.vmem [shape: f32[9,4,128], index: 1, kind: input, shape index: {}]   ;;  %s2446_s2 = inlined_call_operand.vmem [shape: f32[1,128], index: 2, kind: input, shape index: {}]   ;;  %s2447_s3 = inlined_call_operand.vmem [shape: f32[1,128], index: 3, kind: input, shape index: {}]   ;;  %s2448_s4 = inlined_call_operand.hbm [shape: f32[2,8,8,128], index: 4, kind: output, shape index: {}]  }
   0x1   :  { %11 = vsyncpa [#allocation4 + $0x1], 0  ;;  %s1891_s15 = smov 0   ;;  %s1893_s16 = smov 0  }
   0x2   :  { %s1895_s17 = smov 0   ;;  %s1897_s18 = smov 0  }
   0x3   :  { %s1899_s19 = smov 0   ;;  %s1901_s20 = smov 0  }
   0x4 LB: > { %s1558_s21 = sadd.s32 4294967295, %s1862_s20   ;;  %s1559_s22 = sadd.s32 4294967294, %s1862_s20   ;;  %s1862_s20 = sphi %s1901_s20, %s17_s20   ;;  %s1858_s19 = sphi %s1899_s19, %s2455_s19   ;;  %s1854_s18 = sphi %s1897_s18, %s2454_s18   ;;  %s1850_s17 = sphi %s1895_s17, %s2453_s17   ;;  %s1846_s16 = sphi %s1893_s16, %s2452_s16   ;;  %s1842_s15 = sphi %s1891_s15, %s2451_s15  }
   0x5   : > { %s36_s23 = sadd.s32 1, %s1858_s19  ;;  %s43_s24 = sadd.s32 1, %s1850_s17 }
   0x6   : > { %p38_p0 = scmp.ge.s32.totalorder %s36_s23, 2  ;;  %p50_p1 = scmp.ne.s32.totalorder %s1850_s17, %s1846_s16 }
   0x7   : > { %p51_p2 = scmp.eq.s32.totalorder %s1862_s20, 0  ;;  %p162_p3 = scmp.eq.s32.totalorder %s1558_s21, 1 }
   0x8   : > { %s2457_s23 = smov (%p38_p0, %s36_s23), 0  ;;  %p167_p6 = scmp.ne.s32.totalorder %s1846_s16, %s1842_s15 }
   0x9   : > { %p52_p4 = por %p51_p2, %p50_p1  ;;  %p1930_p5 = por %p162_p3, %p50_p1 }
   0xa   : > { %s40_s26 = ssub.s32 %s1858_s19, %s2457_s23  ;;  %p168_p8 = scmp.eq.s32.totalorder %s1559_s22, 1 }
   0xb   : > { %p41_p7 = scmp.eq.s32.totalorder %s40_s26, 0  ;;  %p1564_p10 = scmp.ge.s32.totalorder %s1862_s20, 2 }
   0xc   : > { %p1941_p9 = por %p168_p8, %p167_p6 }
   0xd   : > { %s1939_s27 = scalar_select %p41_p7, %s1850_s17, %s43_s24  }
   0xe   : > { %203 = sbr.rel (%p1564_p10) target bundleno = 96 (0x60), region = 28 }
  0x13   : > { %206 = sbr.rel (!%p52_p4) target bundleno = 96 (0x60), region = 32  ;;  %s208_s29 = sand.u32 (%p52_p4), 1, %s1850_s17  }
  0x14   : > { %s1723_s30 = smul.u32 (%p52_p4), 144, %s1858_s19 }
  0x15   : > { %s1722_s5 = smul.u32 (%p52_p4), 576, %s208_s29 }
  0x16   : > { %s1953_s8 = scalar_lea.vmem (%p52_p4), %s2444_s0, %s1723_s30 }
  0x17   : > { %v384_v0 = vld [vmem:[%s1953_s8] sm:$0xff] (%p52_p4)  ;;  %v386_v1 = vld [vmem:[%s1953_s8 + $0x8] sm:$0xff] (%p52_p4)  ;;  %v388_v2 = vld [vmem:[%s1953_s8 + $0x10] sm:$0xff] (%p52_p4)  ;;  %s1958_s9 = scalar_lea.vmem (%p52_p4), [#allocation2], %s1722_s5 }
  0x18   : > { %385 = vst [vmem:[%s1958_s9] sm:$0xff] %v384_v0  ;;  %v390_v3 = vld [vmem:[%s1953_s8 + $0x18] sm:$0xff]  ;;  %v392_v4 = vld [vmem:[%s1953_s8 + $0x20] sm:$0xff]  ;;  %v394_v5 = vld [vmem:[%s1953_s8 + $0x28] sm:$0xff] }
  0x19   : > { %387 = vst [vmem:[%s1958_s9 + $0x8] sm:$0xff] %v386_v1  ;;  %v396_v6 = vld [vmem:[%s1953_s8 + $0x30] sm:$0xff]  ;;  %v398_v7 = vld [vmem:[%s1953_s8 + $0x38] sm:$0xff]  ;;  %v400_v8 = vld [vmem:[%s1953_s8 + $0x40] sm:$0xff] }
  0x1a   : > { %389 = vst [vmem:[%s1958_s9 + $0x10] sm:$0xff] %v388_v2  ;;  %v402_v9 = vld [vmem:[%s1953_s8 + $0x48] sm:$0xff]  ;;  %v404_v10 = vld [vmem:[%s1953_s8 + $0x50] sm:$0xff]  ;;  %v406_v11 = vld [vmem:[%s1953_s8 + $0x58] sm:$0xff] }
  0x1b   : > { %391 = vst [vmem:[%s1958_s9 + $0x18] sm:$0xff] %v390_v3  ;;  %v408_v12 = vld [vmem:[%s1953_s8 + $0x60] sm:$0xff]  ;;  %v410_v13 = vld [vmem:[%s1953_s8 + $0x68] sm:$0xff]  ;;  %v412_v14 = vld [vmem:[%s1953_s8 + $0x70] sm:$0xff] }
  0x1c   : > { %393 = vst [vmem:[%s1958_s9 + $0x20] sm:$0xff] %v392_v4  ;;  %v414_v15 = vld [vmem:[%s1953_s8 + $0x78] sm:$0xff]  ;;  %v416_v16 = vld [vmem:[%s1953_s8 + $0x80] sm:$0xff]  ;;  %v418_v17 = vld [vmem:[%s1953_s8 + $0x88] sm:$0xff] }
  0x1d   : > { %395 = vst [vmem:[%s1958_s9 + $0x28] sm:$0xff] %v394_v5  ;;  %v420_v18 = vld [vmem:[%s1953_s8 + $0x120] sm:$0xff]  ;;  %v422_v19 = vld [vmem:[%s1953_s8 + $0x128] sm:$0xff]  ;;  %v424_v20 = vld [vmem:[%s1953_s8 + $0x130] sm:$0xff] }
  0x1e   : > { %397 = vst [vmem:[%s1958_s9 + $0x30] sm:$0xff] %v396_v6  ;;  %v426_v21 = vld [vmem:[%s1953_s8 + $0x138] sm:$0xff]  ;;  %v428_v22 = vld [vmem:[%s1953_s8 + $0x140] sm:$0xff]  ;;  %v430_v23 = vld [vmem:[%s1953_s8 + $0x148] sm:$0xff] }
  0x1f   : > { %399 = vst [vmem:[%s1958_s9 + $0x38] sm:$0xff] %v398_v7  ;;  %v432_v24 = vld [vmem:[%s1953_s8 + $0x150] sm:$0xff]  ;;  %v434_v25 = vld [vmem:[%s1953_s8 + $0x158] sm:$0xff]  ;;  %v436_v26 = vld [vmem:[%s1953_s8 + $0x160] sm:$0xff] }
  0x20   : > { %401 = vst [vmem:[%s1958_s9 + $0x40] sm:$0xff] %v400_v8  ;;  %v438_v27 = vld [vmem:[%s1953_s8 + $0x168] sm:$0xff]  ;;  %v440_v28 = vld [vmem:[%s1953_s8 + $0x170] sm:$0xff]  ;;  %v442_v29 = vld [vmem:[%s1953_s8 + $0x178] sm:$0xff] }
  0x21   : > { %403 = vst [vmem:[%s1958_s9 + $0x48] sm:$0xff] %v402_v9  ;;  %v444_v30 = vld [vmem:[%s1953_s8 + $0x180] sm:$0xff]  ;;  %v446_v31 = vld [vmem:[%s1953_s8 + $0x188] sm:$0xff]  ;;  %v448_v32 = vld [vmem:[%s1953_s8 + $0x190] sm:$0xff] }
  0x22   : > { %405 = vst [vmem:[%s1958_s9 + $0x50] sm:$0xff] %v404_v10  ;;  %v450_v33 = vld [vmem:[%s1953_s8 + $0x198] sm:$0xff]  ;;  %v452_v34 = vld [vmem:[%s1953_s8 + $0x1a0] sm:$0xff]  ;;  %v454_v35 = vld [vmem:[%s1953_s8 + $0x1a8] sm:$0xff] }
  0x23   : > { %407 = vst [vmem:[%s1958_s9 + $0x58] sm:$0xff] %v406_v11  ;;  %v456_v36 = vld [vmem:[%s1953_s8 + $0x240] sm:$0xff]  ;;  %v458_v37 = vld [vmem:[%s1953_s8 + $0x248] sm:$0xff]  ;;  %v460_v38 = vld [vmem:[%s1953_s8 + $0x250] sm:$0xff] }
  0x24   : > { %409 = vst [vmem:[%s1958_s9 + $0x60] sm:$0xff] %v408_v12  ;;  %v462_v39 = vld [vmem:[%s1953_s8 + $0x258] sm:$0xff]  ;;  %v464_v40 = vld [vmem:[%s1953_s8 + $0x260] sm:$0xff]  ;;  %v466_v41 = vld [vmem:[%s1953_s8 + $0x268] sm:$0xff] }
  0x25   : > { %411 = vst [vmem:[%s1958_s9 + $0x68] sm:$0xff] %v410_v13  ;;  %v468_v42 = vld [vmem:[%s1953_s8 + $0x270] sm:$0xff]  ;;  %v470_v43 = vld [vmem:[%s1953_s8 + $0x278] sm:$0xff]  ;;  %v472_v44 = vld [vmem:[%s1953_s8 + $0x280] sm:$0xff] }
  0x26   : > { %413 = vst [vmem:[%s1958_s9 + $0x70] sm:$0xff] %v412_v14  ;;  %v474_v45 = vld [vmem:[%s1953_s8 + $0x288] sm:$0xff]  ;;  %v476_v46 = vld [vmem:[%s1953_s8 + $0x290] sm:$0xff]  ;;  %v478_v47 = vld [vmem:[%s1953_s8 + $0x298] sm:$0xff] }
  0x27   : > { %415 = vst [vmem:[%s1958_s9 + $0x78] sm:$0xff] %v414_v15  ;;  %v480_v48 = vld [vmem:[%s1953_s8 + $0x2a0] sm:$0xff]  ;;  %v482_v49 = vld [vmem:[%s1953_s8 + $0x2a8] sm:$0xff]  ;;  %v484_v50 = vld [vmem:[%s1953_s8 + $0x2b0] sm:$0xff] }
  0x28   : > { %417 = vst [vmem:[%s1958_s9 + $0x80] sm:$0xff] %v416_v16  ;;  %v486_v51 = vld [vmem:[%s1953_s8 + $0x2b8] sm:$0xff]  ;;  %v488_v52 = vld [vmem:[%s1953_s8 + $0x2c0] sm:$0xff]  ;;  %v490_v53 = vld [vmem:[%s1953_s8 + $0x2c8] sm:$0xff] }
  0x29   : > { %419 = vst [vmem:[%s1958_s9 + $0x88] sm:$0xff] %v418_v17  ;;  %v492_v54 = vld [vmem:[%s1953_s8 + $0x360] sm:$0xff]  ;;  %v494_v55 = vld [vmem:[%s1953_s8 + $0x368] sm:$0xff]  ;;  %v496_v56 = vld [vmem:[%s1953_s8 + $0x370] sm:$0xff] }
  0x2a   : > { %421 = vst [vmem:[%s1958_s9 + $0x90] sm:$0xff] %v420_v18  ;;  %v498_v57 = vld [vmem:[%s1953_s8 + $0x378] sm:$0xff]  ;;  %v500_v58 = vld [vmem:[%s1953_s8 + $0x380] sm:$0xff]  ;;  %v502_v59 = vld [vmem:[%s1953_s8 + $0x388] sm:$0xff] }
  0x2b   : > { %423 = vst [vmem:[%s1958_s9 + $0x98] sm:$0xff] %v422_v19  ;;  %v504_v60 = vld [vmem:[%s1953_s8 + $0x390] sm:$0xff]  ;;  %v506_v61 = vld [vmem:[%s1953_s8 + $0x398] sm:$0xff]  ;;  %v508_v62 = vld [vmem:[%s1953_s8 + $0x3a0] sm:$0xff] }
  0x2c   : > { %425 = vst [vmem:[%s1958_s9 + $0xa0] sm:$0xff] %v424_v20  ;;  %v510_v63 = vld [vmem:[%s1953_s8 + $0x3a8] sm:$0xff]  ;;  %v512_v0 = vld [vmem:[%s1953_s8 + $0x3b0] sm:$0xff]  ;;  %v514_v1 = vld [vmem:[%s1953_s8 + $0x3b8] sm:$0xff] }
  0x2d   : > { %427 = vst [vmem:[%s1958_s9 + $0xa8] sm:$0xff] %v426_v21  ;;  %v516_v2 = vld [vmem:[%s1953_s8 + $0x3c0] sm:$0xff]  ;;  %v518_v3 = vld [vmem:[%s1953_s8 + $0x3c8] sm:$0xff]  ;;  %v520_v4 = vld [vmem:[%s1953_s8 + $0x3d0] sm:$0xff] }
  0x2e   : > { %429 = vst [vmem:[%s1958_s9 + $0xb0] sm:$0xff] %v428_v22  ;;  %v522_v5 = vld [vmem:[%s1953_s8 + $0x3d8] sm:$0xff]  ;;  %v524_v6 = vld [vmem:[%s1953_s8 + $0x3e0] sm:$0xff]  ;;  %v526_v7 = vld [vmem:[%s1953_s8 + $0x3e8] sm:$0xff] }
  0x2f   : > { %431 = vst [vmem:[%s1958_s9 + $0xb8] sm:$0xff] %v430_v23 }
  0x30   : > { %433 = vst [vmem:[%s1958_s9 + $0xc0] sm:$0xff] %v432_v24 }
  0x31   : > { %435 = vst [vmem:[%s1958_s9 + $0xc8] sm:$0xff] %v434_v25 }
  0x32   : > { %437 = vst [vmem:[%s1958_s9 + $0xd0] sm:$0xff] %v436_v26 }
  0x33   : > { %439 = vst [vmem:[%s1958_s9 + $0xd8] sm:$0xff] %v438_v27 }
  0x34   : > { %441 = vst [vmem:[%s1958_s9 + $0xe0] sm:$0xff] %v440_v28 }
  0x35   : > { %443 = vst [vmem:[%s1958_s9 + $0xe8] sm:$0xff] %v442_v29 }
  0x36   : > { %445 = vst [vmem:[%s1958_s9 + $0xf0] sm:$0xff] %v444_v30 }
  0x37   : > { %447 = vst [vmem:[%s1958_s9 + $0xf8] sm:$0xff] %v446_v31 }
  0x38   : > { %449 = vst [vmem:[%s1958_s9 + $0x100] sm:$0xff] %v448_v32 }
  0x39   : > { %451 = vst [vmem:[%s1958_s9 + $0x108] sm:$0xff] %v450_v33 }
  0x3a   : > { %453 = vst [vmem:[%s1958_s9 + $0x110] sm:$0xff] %v452_v34 }
  0x3b   : > { %455 = vst [vmem:[%s1958_s9 + $0x118] sm:$0xff] %v454_v35 }
  0x3c   : > { %457 = vst [vmem:[%s1958_s9 + $0x120] sm:$0xff] %v456_v36 }
  0x3d   : > { %459 = vst [vmem:[%s1958_s9 + $0x128] sm:$0xff] %v458_v37 }
  0x3e   : > { %461 = vst [vmem:[%s1958_s9 + $0x130] sm:$0xff] %v460_v38 }
  0x3f   : > { %463 = vst [vmem:[%s1958_s9 + $0x138] sm:$0xff] %v462_v39 }
  0x40   : > { %465 = vst [vmem:[%s1958_s9 + $0x140] sm:$0xff] %v464_v40 }
  0x41   : > { %467 = vst [vmem:[%s1958_s9 + $0x148] sm:$0xff] %v466_v41 }
  0x42   : > { %469 = vst [vmem:[%s1958_s9 + $0x150] sm:$0xff] %v468_v42 }
  0x43   : > { %471 = vst [vmem:[%s1958_s9 + $0x158] sm:$0xff] %v470_v43 }
  0x44   : > { %473 = vst [vmem:[%s1958_s9 + $0x160] sm:$0xff] %v472_v44 }
  0x45   : > { %475 = vst [vmem:[%s1958_s9 + $0x168] sm:$0xff] %v474_v45 }
  0x46   : > { %477 = vst [vmem:[%s1958_s9 + $0x170] sm:$0xff] %v476_v46 }
  0x47   : > { %479 = vst [vmem:[%s1958_s9 + $0x178] sm:$0xff] %v478_v47 }
  0x48   : > { %481 = vst [vmem:[%s1958_s9 + $0x180] sm:$0xff] %v480_v48 }
  0x49   : > { %483 = vst [vmem:[%s1958_s9 + $0x188] sm:$0xff] %v482_v49 }
  0x4a   : > { %485 = vst [vmem:[%s1958_s9 + $0x190] sm:$0xff] %v484_v50 }
  0x4b   : > { %487 = vst [vmem:[%s1958_s9 + $0x198] sm:$0xff] %v486_v51 }
  0x4c   : > { %489 = vst [vmem:[%s1958_s9 + $0x1a0] sm:$0xff] %v488_v52 }
  0x4d   : > { %491 = vst [vmem:[%s1958_s9 + $0x1a8] sm:$0xff] %v490_v53 }
  0x4e   : > { %493 = vst [vmem:[%s1958_s9 + $0x1b0] sm:$0xff] %v492_v54 }
  0x4f   : > { %495 = vst [vmem:[%s1958_s9 + $0x1b8] sm:$0xff] %v494_v55 }
  0x50   : > { %497 = vst [vmem:[%s1958_s9 + $0x1c0] sm:$0xff] %v496_v56 }
  0x51   : > { %499 = vst [vmem:[%s1958_s9 + $0x1c8] sm:$0xff] %v498_v57 }
  0x52   : > { %501 = vst [vmem:[%s1958_s9 + $0x1d0] sm:$0xff] %v500_v58 }
  0x53   : > { %503 = vst [vmem:[%s1958_s9 + $0x1d8] sm:$0xff] %v502_v59 }
  0x54   : > { %505 = vst [vmem:[%s1958_s9 + $0x1e0] sm:$0xff] %v504_v60 }
  0x55   : > { %507 = vst [vmem:[%s1958_s9 + $0x1e8] sm:$0xff] %v506_v61 }
  0x56   : > { %509 = vst [vmem:[%s1958_s9 + $0x1f0] sm:$0xff] %v508_v62 }
  0x57   : > { %511 = vst [vmem:[%s1958_s9 + $0x1f8] sm:$0xff] %v510_v63 }
  0x58   : > { %513 = vst [vmem:[%s1958_s9 + $0x200] sm:$0xff] %v512_v0 }
  0x59   : > { %515 = vst [vmem:[%s1958_s9 + $0x208] sm:$0xff] %v514_v1 }
  0x5a   : > { %517 = vst [vmem:[%s1958_s9 + $0x210] sm:$0xff] %v516_v2 }
  0x5b   : > { %519 = vst [vmem:[%s1958_s9 + $0x218] sm:$0xff] %v518_v3 }
  0x5c   : > { %521 = vst [vmem:[%s1958_s9 + $0x220] sm:$0xff] %v520_v4 }
  0x5d   : > { %523 = vst [vmem:[%s1958_s9 + $0x228] sm:$0xff] %v522_v5 }
  0x5e   : > { %525 = vst [vmem:[%s1958_s9 + $0x230] sm:$0xff] %v524_v6 }
  0x5f   : > { %527 = vst [vmem:[%s1958_s9 + $0x238] sm:$0xff] %v526_v7 }
  0x60 PF: > { %p1566_p11 = scmp.ge.s32.totalorder %s1862_s20, 1  ;;  %p532_p12 = scmp.lt.s32.totalorder %s1862_s20, 3 }
  0x62   : > { %p533_p13 = pnand %p1566_p11, %p532_p12 }
  0x63   : > { %s2107_s12 = sand.u32 (!%p533_p13), 1, %s1846_s16   ;;  %s1718_s6 = sshll.u32 (!%p533_p13), %s1854_s18, 6 }
  0x64   : > { %536 = sbr.rel (%p533_p13) target bundleno = 394 (0x18a), region = 70  ;;  %s1567_s30 = sshll.u32 (!%p533_p13), %s2107_s12, 6 }
  0x65   : > { %s1724_s13 = smul.u32 (!%p533_p13), 576, %s2107_s12  ;;  %s2360_s5 = scalar_lea.vmem (!%p533_p13), [#allocation3], %s1567_s30 }
  0x66   : > { %s1413_s9 = scalar_lea.hbm (!%p533_p13), %s2448_s4, %s1718_s6  ;;  %s1414_s10 = sshll.u32 (!%p533_p13), %s2360_s5, 4  ;;  %s1415_s10 = int_to_ptr.vmem [resolvable:$true] %s1414_s10 }
  0x67   : > { %s2131_s8 = scalar_lea.vmem (!%p533_p13), [#allocation2], %s1724_s13  ;;  %s1416_s11 = sshll.u32 (!%p533_p13), %s1413_s9, 4  ;;  %s1417_s11 = int_to_ptr.hbm [resolvable:$true] %s1416_s11 }
  0x68   : > { %s1399_s18 = scalar_lea.sflag (!%p533_p13), [#allocation4], %s2107_s12  ;;  %s1798_s13 = sshra.s32 (!%p533_p13), %s1417_s11, 4  ;;  %s1799_s13 = int_to_ptr.hbm [resolvable:$true] %s1798_s13 }
  0x69   : > { %v1576_v8 = vld [vmem:[%s2445_s1 + $0x4] sm:$0xf]  ;;  %vm634_vm0 = vcmask 1043456   ;;  %v1595_v9 = vld [vmem:[%s2445_s1 + $0x8] sm:$0xf]  ;;  %vm609_vm1 = vcmask 31744   ;;  %p1805_p3 = scmp.lt.s32.totalorder %s1799_s13, %s2448_s4 }
  0x6a   : > { %1719 = vmatpush.msk.msra.mxu1 %vm634_vm0, %v1576_v8  ;;  %1720 = vmatpush.msk.msra.mxu2 %vm634_vm0, %v1576_v8  ;;  %v1613_v10 = vld [vmem:[%s2445_s1 + $0xc] sm:$0xf]  ;;  %v596_v11 = vld [vmem:[%s2445_s1] sm:$0xf]  ;;  %v1631_v12 = vld [vmem:[%s2445_s1 + $0x10] sm:$0xf] }
  0x6b   : > { %1721 = vmatpush.msk.msra.mxu3 %vm634_vm0, %v1576_v8  ;;  %v1667_v13 = vld [vmem:[%s2445_s1 + $0x18] sm:$0xf]  ;;  %v2134_v14 = vld [vmem:[%s2131_s8 + $0xb0] sm:$0xff]  ;;  %1577 = vmatpush.msk.msra.mxu0 %vm634_vm0, %v1576_v8  ;;  %v1685_v18 = vld [vmem:[%s2445_s1 + $0x1c] sm:$0xf]  ;;  %s1800_s14 = scalar_lea.hbm %s1799_s13, 64 }
  0x6c   : > { %1596 = vmatpush.msk.msrb.mxu2 %vm634_vm0, %v1595_v9  ;;  %1586 = vmatpush.msk.msrb.mxu1 %vm634_vm0, %v596_v11  ;;  %v2137_v15 = vld [vmem:[%s2131_s8 + $0xd0] sm:$0xff]  ;;  %v1703_v20 = vld [vmem:[%s2445_s1 + $0x20] sm:$0xf]  ;;  %p1801_p0 = scmp.ne.s32.totalorder %s1799_s13, %s1800_s14  ;;  %s1804_s24 = scalar_lea.hbm %s2448_s4, 128 }
  0x6d   : > { %1614 = vmatpush.msk.msrb.mxu3 %vm634_vm0, %v1613_v10  ;;  %v2140_v16 = vld [vmem:[%s2131_s8 + $0xf0] sm:$0xff]  ;;  %1580 = vmatmul.msk.f32.vlgmr.msra.gmra.mxu1 %vm609_vm1, %v2134_v14  ;;  %v2165_v21 = vld [vmem:[%s2131_s8 + $0xc0] sm:$0xff]  ;;  %p1806_p4 = scmp.lt.s32.totalorder %s1804_s24, %s1800_s14 }
  0x6e   : > { %1582 = vmatmul.msk.f32.vlgmr.msra.gmra.mxu2 %vm609_vm1, %v2137_v15  ;;  %v1568_v17 = vld [vmem:[%s2131_s8 + $0x90] sm:$0xff]  ;;  %1584 = vmatmul.msk.f32.vlgmr.msra.gmra.mxu3 %vm609_vm1, %v2140_v16  ;;  %v2168_v22 = vld [vmem:[%s2131_s8 + $0xe0] sm:$0xff]  ;;  %p1802_p1 = pnand %p1801_p0, %p1930_p5 }
  0x6f   : > { %v1649_v19 = vld [vmem:[%s2445_s1 + $0x14] sm:$0xf]  ;;  %1578 = vmatmul.msk.f32.vlgmr.msra.gmra.mxu0 %vm609_vm1, %v1568_v17  ;;  %1668 = vmatpush.msk.msra.mxu2 %vm634_vm0, %v1667_v13  ;;  %v2171_v23 = vld [vmem:[%s2131_s8 + $0x100] sm:$0xff]  ;;  %p1807_p6 = por %p1806_p4, %p1805_p3 }
  0x70   : > { %1632 = vmatpush.msk.msrb.mxu0 %vm634_vm0, %v1631_v12  ;;  %1686 = vmatpush.msk.msra.mxu3 %vm634_vm0, %v1685_v18  ;;  %v2175_v24 = vld [vmem:[%s2131_s8 + $0xa0] sm:$0xff]  ;;  %v1623_v28 = vld [vmem:[%s2131_s8 + $0x1b0] sm:$0xff]  ;;  %p1803_p2 = pneg %p1802_p1 }
  0x71   : > { %1650 = vmatpush.msk.msra.mxu1 %vm634_vm0, %v1649_v19  ;;  %v588_v25 = vld [vmem:[%s2131_s8] sm:$0xff]  ;;  %v589_v29 = vld [vmem:[%s2131_s8 + $0x10] sm:$0xff] }
  0x72   : > { %1704 = vmatpush.msk.msra.mxu0 %vm634_vm0, %v1703_v20  ;;  %v747_v26 = vld [vmem:[%s2131_s8 + $0x1] sm:$0xff]  ;;  %v748_v30 = vld [vmem:[%s2131_s8 + $0x11] sm:$0xff]  ;;  %p1808_p7 = pnand %p1807_p6, %p1803_p2 }
  0x73   : > { %v1605_v27 = vld [vmem:[%s2131_s8 + $0x120] sm:$0xff]  ;;  %v1606_v31 = vld [vmem:[%s2131_s8 + $0x130] sm:$0xff] }
  0x74   : > { %v1624_v32 = vld [vmem:[%s2131_s8 + $0x1c0] sm:$0xff]  ;;  %v1625_v36 = vld [vmem:[%s2131_s8 + $0x1d0] sm:$0xff] }
  0x75   : > { %1581 = vmatmul.msk.f32.gmra.mxu1 %vm609_vm1, %v2165_v21  ;;  %v590_v33 = vld [vmem:[%s2131_s8 + $0x20] sm:$0xff]  ;;  %v591_v37 = vld [vmem:[%s2131_s8 + $0x30] sm:$0xff] }
  0x76   : > { %1583 = vmatmul.msk.f32.gmra.mxu2 %vm609_vm1, %v2168_v22  ;;  %1585 = vmatmul.msk.f32.gmra.mxu3 %vm609_vm1, %v2171_v23  ;;  %v749_v34 = vld [vmem:[%s2131_s8 + $0x21] sm:$0xff]  ;;  %v750_v38 = vld [vmem:[%s2131_s8 + $0x31] sm:$0xff] }
  0x77   : > { %1579 = vmatmul.msk.f32.gmra.mxu0 %vm609_vm1, %v2175_v24  ;;  %v1607_v35 = vld [vmem:[%s2131_s8 + $0x140] sm:$0xff]  ;;  %v1608_v39 = vld [vmem:[%s2131_s8 + $0x150] sm:$0xff] }
  0x78   : > { %v1626_v40 = vld [vmem:[%s2131_s8 + $0x1e0] sm:$0xff]  ;;  %v1627_v44 = vld [vmem:[%s2131_s8 + $0x1f0] sm:$0xff] }
  0x79   : > { %v592_v41 = vld [vmem:[%s2131_s8 + $0x40] sm:$0xff]  ;;  %v593_v45 = vld [vmem:[%s2131_s8 + $0x50] sm:$0xff] }
  0x7a   : > { %v751_v42 = vld [vmem:[%s2131_s8 + $0x41] sm:$0xff]  ;;  %v752_v46 = vld [vmem:[%s2131_s8 + $0x51] sm:$0xff] }
  0x7b   : > { %v1609_v43 = vld [vmem:[%s2131_s8 + $0x160] sm:$0xff]  ;;  %v1610_v47 = vld [vmem:[%s2131_s8 + $0x170] sm:$0xff] }
  0x7c   : > { %v1628_v48 = vld [vmem:[%s2131_s8 + $0x200] sm:$0xff]  ;;  %v1629_v52 = vld [vmem:[%s2131_s8 + $0x210] sm:$0xff] }
  0x7d   : > { %1587 = vmatmul.msk.f32.vlgmr.msrb.gmra.mxu1 %vm609_vm1, %v588_v25  ;;  %v594_v49 = vld [vmem:[%s2131_s8 + $0x60] sm:$0xff]  ;;  %v595_v53 = vld [vmem:[%s2131_s8 + $0x70] sm:$0xff] }
  0x7e   : > { %1597 = vmatmul.msk.f32.vlgmr.msrb.gmra.mxu2 %vm609_vm1, %v747_v26  ;;  %1615 = vmatmul.msk.f32.vlgmr.msrb.gmra.mxu3 %vm609_vm1, %v1605_v27  ;;  %v753_v50 = vld [vmem:[%s2131_s8 + $0x61] sm:$0xff]  ;;  %v754_v54 = vld [vmem:[%s2131_s8 + $0x71] sm:$0xff] }
  0x7f   : > { %1633 = vmatmul.msk.f32.vlgmr.msrb.gmra.mxu0 %vm609_vm1, %v1623_v28  ;;  %v1611_v51 = vld [vmem:[%s2131_s8 + $0x180] sm:$0xff]  ;;  %v1612_v55 = vld [vmem:[%s2131_s8 + $0x190] sm:$0xff] }
  0x80   : > { %v1630_v56 = vld [vmem:[%s2131_s8 + $0x220] sm:$0xff]  ;;  %v1642_v58 = vld [vmem:[%s2131_s8 + $0x131] sm:$0xff] }
  0x81   : > { %v1641_v57 = vld [vmem:[%s2131_s8 + $0x121] sm:$0xff]  ;;  %v1644_v60 = vld [vmem:[%s2131_s8 + $0x151] sm:$0xff] }
  0x82   : > { %v1643_v59 = vld [vmem:[%s2131_s8 + $0x141] sm:$0xff]  ;;  %v1646_v62 = vld [vmem:[%s2131_s8 + $0x171] sm:$0xff] }
  0x83   : > { %v1645_v61 = vld [vmem:[%s2131_s8 + $0x161] sm:$0xff]  ;;  %v1648_v5 = vld [vmem:[%s2131_s8 + $0x191] sm:$0xff] }
  0x84   : > { %v1647_v0 = vld [vmem:[%s2131_s8 + $0x181] sm:$0xff]  ;;  %v1684_v7 = vld [vmem:[%s2131_s8 + $0x110] sm:$0xff] }
  0x85   : > { %1588 = vmatmul.msk.f32.gmra.mxu1 %vm609_vm1, %v589_v29  ;;  %v1666_v6 = vld [vmem:[%s2131_s8 + $0x80] sm:$0xff] }
  0x86   : > { %1598 = vmatmul.msk.f32.gmra.mxu2 %vm609_vm1, %v748_v30  ;;  %1616 = vmatmul.msk.f32.gmra.mxu3 %vm609_vm1, %v1606_v31  ;;  %v1702_v9 = vld [vmem:[%s2131_s8 + $0x81] sm:$0xff] }
  0x87   : > { %1634 = vmatmul.msk.f32.gmra.mxu0 %vm609_vm1, %v1624_v32 }
  0x8d   : > { %1589 = vmatmul.msk.f32.gmra.mxu1 %vm609_vm1, %v590_v33 }
  0x8e   : > { %1599 = vmatmul.msk.f32.gmra.mxu2 %vm609_vm1, %v749_v34  ;;  %1617 = vmatmul.msk.f32.gmra.mxu3 %vm609_vm1, %v1607_v35 }
  0x8f   : > { %1635 = vmatmul.msk.f32.gmra.mxu0 %vm609_vm1, %v1625_v36 }
  0x95   : > { %1590 = vmatmul.msk.f32.gmra.mxu1 %vm609_vm1, %v591_v37 }
  0x96   : > { %1600 = vmatmul.msk.f32.gmra.mxu2 %vm609_vm1, %v750_v38  ;;  %1618 = vmatmul.msk.f32.gmra.mxu3 %vm609_vm1, %v1608_v39 }
  0x97   : > { %1636 = vmatmul.msk.f32.gmra.mxu0 %vm609_vm1, %v1626_v40 }
  0x9d   : > { %1591 = vmatmul.msk.f32.gmra.mxu1 %vm609_vm1, %v592_v41 }
  0x9e   : > { %1601 = vmatmul.msk.f32.gmra.mxu2 %vm609_vm1, %v751_v42  ;;  %1619 = vmatmul.msk.f32.gmra.mxu3 %vm609_vm1, %v1609_v43 }
  0x9f   : > { %1637 = vmatmul.msk.f32.gmra.mxu0 %vm609_vm1, %v1627_v44 }
  0xa5   : > { %1592 = vmatmul.msk.f32.gmra.mxu1 %vm609_vm1, %v593_v45 }
  0xa6   : > { %1602 = vmatmul.msk.f32.gmra.mxu2 %vm609_vm1, %v752_v46  ;;  %1620 = vmatmul.msk.f32.gmra.mxu3 %vm609_vm1, %v1610_v47 }
  0xa7   : > { %1638 = vmatmul.msk.f32.gmra.mxu0 %vm609_vm1, %v1628_v48 }
  0xad   : > { %1593 = vmatmul.msk.f32.gmra.mxu1 %vm609_vm1, %v594_v49 }
  0xae   : > { %1603 = vmatmul.msk.f32.gmra.mxu2 %vm609_vm1, %v753_v50  ;;  %1621 = vmatmul.msk.f32.gmra.mxu3 %vm609_vm1, %v1611_v51 }
  0xaf   : > { %1639 = vmatmul.msk.f32.gmra.mxu0 %vm609_vm1, %v1629_v52 }
  0xb5   : > { %1594 = vmatmul.msk.f32.gmra.mxu1 %vm609_vm1, %v595_v53 }
  0xb6   : > { %1604 = vmatmul.msk.f32.gmra.mxu2 %vm609_vm1, %v754_v54  ;;  %1622 = vmatmul.msk.f32.gmra.mxu3 %vm609_vm1, %v1612_v55 }
  0xb7   : > { %1640 = vmatmul.msk.f32.gmra.mxu0 %vm609_vm1, %v1630_v56 }
  0xbd   : > { %1651 = vmatmul.msk.f32.vlgmr.msra.gmra.mxu1 %vm609_vm1, %v1641_v57 }
  0xbe   : > { %1669 = vmatmul.msk.f32.vlgmr.msra.gmra.mxu2 %vm609_vm1, %v589_v29  ;;  %1687 = vmatmul.msk.f32.vlgmr.msra.gmra.mxu3 %vm609_vm1, %v2175_v24 }
  0xbf   : > { %1705 = vmatmul.msk.f32.vlgmr.msra.gmra.mxu0 %vm609_vm1, %v748_v30 }
  0xc5   : > { %1652 = vmatmul.msk.f32.gmra.mxu1 %vm609_vm1, %v1642_v58 }
  0xc6   : > { %1670 = vmatmul.msk.f32.gmra.mxu2 %vm609_vm1, %v590_v33  ;;  %1688 = vmatmul.msk.f32.gmra.mxu3 %vm609_vm1, %v2134_v14 }
  0xc7   : > { %1706 = vmatmul.msk.f32.gmra.mxu0 %vm609_vm1, %v749_v34 }
  0xcd   : > { %1653 = vmatmul.msk.f32.gmra.mxu1 %vm609_vm1, %v1643_v59 }
  0xce   : > { %1671 = vmatmul.msk.f32.gmra.mxu2 %vm609_vm1, %v591_v37  ;;  %1689 = vmatmul.msk.f32.gmra.mxu3 %vm609_vm1, %v2165_v21 }
  0xcf   : > { %1707 = vmatmul.msk.f32.gmra.mxu0 %vm609_vm1, %v750_v38 }
  0xd5   : > { %1654 = vmatmul.msk.f32.gmra.mxu1 %vm609_vm1, %v1644_v60  ;;  %v2349_v60 = vld [vmem:[%s2446_s2] ss:$0 sm:$0xff] }
  0xd6   : > { %1672 = vmatmul.msk.f32.gmra.mxu2 %vm609_vm1, %v592_v41  ;;  %1690 = vmatmul.msk.f32.gmra.mxu3 %vm609_vm1, %v2137_v15 }
  0xd7   : > { %1708 = vmatmul.msk.f32.gmra.mxu0 %vm609_vm1, %v751_v42 }
  0xdd   : > { %1655 = vmatmul.msk.f32.gmra.mxu1 %vm609_vm1, %v1645_v61 }
  0xde   : > { %1673 = vmatmul.msk.f32.gmra.mxu2 %vm609_vm1, %v593_v45  ;;  %1691 = vmatmul.msk.f32.gmra.mxu3 %vm609_vm1, %v2168_v22 }
  0xdf   : > { %1709 = vmatmul.msk.f32.gmra.mxu0 %vm609_vm1, %v752_v46 }
  0xe5   : > { %1656 = vmatmul.msk.f32.gmra.mxu1 %vm609_vm1, %v1646_v62 }
  0xe6   : > { %1674 = vmatmul.msk.f32.gmra.mxu2 %vm609_vm1, %v594_v49  ;;  %1692 = vmatmul.msk.f32.gmra.mxu3 %vm609_vm1, %v2140_v16 }
  0xe7   : > { %1710 = vmatmul.msk.f32.gmra.mxu0 %vm609_vm1, %v753_v50 }
  0xea   : > { %v2285_v63 = vpop.f32.mrf.mxu1 }
  0xec   : > { %v655_v1 = vpop.f32.mrf.mxu0 }
  0xed   : > { %1657 = vmatmul.msk.f32.gmra.mxu1 %vm609_vm1, %v1647_v0 }
  0xee   : > { %1675 = vmatmul.msk.f32.gmra.mxu2 %vm609_vm1, %v595_v53  ;;  %1693 = vmatmul.msk.f32.gmra.mxu3 %vm609_vm1, %v2171_v23 }
  0xef   : > { %1711 = vmatmul.msk.f32.gmra.mxu0 %vm609_vm1, %v754_v54 }
  0xf1   : > { %v2293_v2 = vpop.f32.mrf.mxu2  ;;  %v2295_v3 = vpop.f32.mrf.mxu3 }
  0xf2   : > { %v2297_v4 = vpop.f32.mrf.mxu1 }
  0xf4   : > { %v658_v8 = vpop.f32.mrf.mxu0 }
  0xf5   : > { %1658 = vmatmul.msk.f32.gmra.mxu1 %vm609_vm1, %v1648_v5  ;;  %v2354_v5 = vld [vmem:[%s2447_s3] ss:$0 sm:$0xff] }
  0xf6   : > { %1676 = vmatmul.msk.f32.gmra.mxu2 %vm609_vm1, %v1666_v6  ;;  %1694 = vmatmul.msk.f32.gmra.mxu3 %vm609_vm1, %v1684_v7 }
  0xf7   : > { %1712 = vmatmul.msk.f32.gmra.mxu0 %vm609_vm1, %v1702_v9 }
  0xf9   : > { %v2307_v10 = vpop.f32.mrf.mxu2  ;;  %v2309_v11 = vpop.f32.mrf.mxu3 }
  0xfa   : > { %v723_v12 = vpop.f32.mrf.mxu1 }
  0xfb   : > { %v724_v41 = vadd.f32 %v723_v12, %v655_v1 }
  0xfc   : > { %v977_v13 = vpop.f32.mrf.mxu0 }
 0x101   : > { %v801_v14 = vpop.f32.mrf.mxu2  ;;  %v889_v15 = vpop.f32.mrf.mxu3 }
 0x102   : > { %v726_v16 = vpop.f32.mrf.mxu1  ;;  %v825_v43 = vadd.f32 %v801_v14, %v724_v41 }
 0x103   : > { %v727_v48 = vadd.f32 %v726_v16, %v658_v8 }
 0x104   : > { %v980_v17 = vpop.f32.mrf.mxu0  ;;  %v913_v45 = vadd.f32 %v889_v15, %v825_v43 }
 0x106   : > { %v1001_v50 = vadd.f32 %v977_v13, %v913_v45 }
 0x109   : > { %v804_v18 = vpop.f32.mrf.mxu2  ;;  %v892_v19 = vpop.f32.mrf.mxu3 }
 0x10a   : > { %v729_v20 = vpop.f32.mrf.mxu1  ;;  %v826_v51 = vadd.f32 %v804_v18, %v727_v48 }
 0x10b   : > { %v730_v58 = vadd.f32 %v729_v20, %v2285_v63 }
 0x10c   : > { %v983_v21 = vpop.f32.mrf.mxu0  ;;  %v914_v54 = vadd.f32 %v892_v19, %v826_v51 }
 0x10e   : > { %v1002_v62 = vadd.f32 %v980_v17, %v914_v54 }
 0x111   : > { %v807_v22 = vpop.f32.mrf.mxu2  ;;  %v895_v23 = vpop.f32.mrf.mxu3 }
 0x112   : > { %v732_v24 = vpop.f32.mrf.mxu1  ;;  %v827_v0 = vadd.f32 %v807_v22, %v730_v58 }
 0x113   : > { %v733_v15 = vadd.f32 %v732_v24, %v2297_v4 }
 0x114   : > { %v2311_v25 = vpop.f32.mrf.mxu0  ;;  %v915_v8 = vadd.f32 %v895_v23, %v827_v0 }
 0x116   : > { %v1003_v19 = vadd.f32 %v983_v21, %v915_v8 }
 0x119   : > { %v810_v26 = vpop.f32.mrf.mxu2  ;;  %v898_v27 = vpop.f32.mrf.mxu3 }
 0x11a   : > { %v2313_v28 = vpop.f32.mrf.mxu1  ;;  %v828_v20 = vadd.f32 %v810_v26, %v733_v15 }
 0x11b   : > { %v736_v21 = vadd.f32 %v2313_v28, %v2293_v2 }
 0x11c   : > { %v2315_v29 = vpop.f32.mrf.mxu0  ;;  %v916_v45 = vadd.f32 %v898_v27, %v828_v20 }
 0x11e   : > { %v1004_v51 = vadd.f32 %v2311_v25, %v916_v45 }
 0x121   : > { %v2317_v30 = vpop.f32.mrf.mxu2  ;;  %v2319_v31 = vpop.f32.mrf.mxu3 }
 0x122   : > { %v2321_v32 = vpop.f32.mrf.mxu1 }
 0x124   : > { %v2323_v33 = vpop.f32.mrf.mxu0 }
 0x129   : > { %v2325_v34 = vpop.f32.mrf.mxu2  ;;  %v2327_v35 = vpop.f32.mrf.mxu3 }
 0x12a   : > { %v2329_v36 = vpop.f32.mrf.mxu1 }
 0x12c   : > { %v2331_v37 = vpop.f32.mrf.mxu0 }
 0x131   : > { %v2333_v38 = vpop.f32.mrf.mxu2  ;;  %v2335_v39 = vpop.f32.mrf.mxu3 }
 0x132   : > { %v2337_v40 = vpop.f32.mrf.mxu1 }
 0x134   : > { %v2339_v42 = vpop.f32.mrf.mxu0 }
 0x139   : > { %v2341_v44 = vpop.f32.mrf.mxu2  ;;  %v2343_v46 = vpop.f32.mrf.mxu3 }
 0x13a   : > { %v1063_v47 = vpop.f32.mrf.mxu1 }
 0x13b   : > { %v1087_v52 = vadd.f32 %v1063_v47, %v1001_v50 }
 0x13c   : > { %v1326_v49 = vpop.f32.mrf.mxu0 }
 0x141   : > { %v1152_v53 = vpop.f32.mrf.mxu2  ;;  %v1240_v56 = vpop.f32.mrf.mxu3 }
 0x142   : > { %v1176_v55 = vadd.f32 %v1152_v53, %v1087_v52  ;;  %v1066_v57 = vpop.f32.mrf.mxu1  ;;  %v829_v52 = vadd.f32 %v2317_v30, %v736_v21 }
 0x143   : > { %v1088_v6 = vadd.f32 %v1066_v57, %v1002_v62 }
 0x144   : > { %v1264_v59 = vadd.f32 %v1240_v56, %v1176_v55  ;;  %v1329_v61 = vpop.f32.mrf.mxu0  ;;  %v917_v56 = vadd.f32 %v2319_v31, %v829_v52 }
 0x146   : > { %v1350_v1 = vadd.f32 %v1326_v49, %v1264_v59  ;;  %v739_v59 = vadd.f32 %v2321_v32, %v2307_v10  ;;  %v1005_v62 = vadd.f32 %v2315_v29, %v917_v56 }
 0x148   : > { %v1362_v7 = vmul.f32 %v2349_v60, %v1350_v1  ;;  %v830_v0 = vadd.f32 %v2325_v34, %v739_v59 }
 0x149   : > { %v1155_v63 = vpop.f32.mrf.mxu2  ;;  %v1243_v13 = vpop.f32.mrf.mxu3 }
 0x14a   : > { %v1374_v9 = vadd.f32 %v2354_v5, %v1362_v7  ;;  %v1177_v12 = vadd.f32 %v1155_v63, %v1088_v6  ;;  %v1069_v14 = vpop.f32.mrf.mxu1  ;;  %v918_v63 = vadd.f32 %v2327_v35, %v830_v0 }
 0x14b   : > { %v1089_v41 = vadd.f32 %v1069_v14, %v1003_v19 }
 0x14c   : > { %v1382_v16 = vmax.f32 %v1374_v9, 0.0  ;;  %v1265_v17 = vadd.f32 %v1243_v13, %v1177_v12  ;;  %v1332_v18 = vpop.f32.mrf.mxu0  ;;  %v742_v12 = vadd.f32 %v2329_v36, %v2295_v3  ;;  %v1006_v34 = vadd.f32 %v2323_v33, %v918_v63 }
 0x14d   : > { %v745_v33 = vadd.f32 %v2337_v40, %v2309_v11 }
 0x14e   : > { %1390 = vst [vmem:[%s2360_s5] sm:$0xff] %v1382_v16  ;;  %v1351_v22 = vadd.f32 %v1329_v61, %v1265_v17  ;;  %v831_v14 = vadd.f32 %v2333_v38, %v742_v12 }
 0x150   : > { %v1363_v23 = vmul.f32 %v2349_v60, %v1351_v22  ;;  %v919_v19 = vadd.f32 %v2335_v39, %v831_v14 }
 0x151   : > { %v1158_v43 = vpop.f32.mrf.mxu2  ;;  %v1246_v4 = vpop.f32.mrf.mxu3 }
 0x152   : > { %v1375_v47 = vadd.f32 %v2354_v5, %v1363_v23  ;;  %v1178_v48 = vadd.f32 %v1158_v43, %v1089_v41  ;;  %v1072_v24 = vpop.f32.mrf.mxu1  ;;  %v1007_v23 = vadd.f32 %v2331_v37, %v919_v19  ;;  %v832_v43 = vadd.f32 %v2341_v44, %v745_v33 }
 0x153   : > { %v1090_v54 = vadd.f32 %v1072_v24, %v1004_v51 }
 0x154   : > { %v1383_v26 = vmax.f32 %v1375_v47, 0.0  ;;  %v1266_v49 = vadd.f32 %v1246_v4, %v1178_v48  ;;  %v1335_v50 = vpop.f32.mrf.mxu0  ;;  %v920_v24 = vadd.f32 %v2343_v46, %v832_v43 }
 0x156   : > { %1391 = vst [vmem:[%s2360_s5 + $0x8] sm:$0xff] %v1383_v26  ;;  %v1352_v53 = vadd.f32 %v1332_v18, %v1266_v49  ;;  %v1008_v44 = vadd.f32 %v2339_v42, %v920_v24 }
 0x158   : > { %v1364_v27 = vmul.f32 %v2349_v60, %v1352_v53 }
 0x159   : > { %v1161_v55 = vpop.f32.mrf.mxu2  ;;  %v1249_v2 = vpop.f32.mrf.mxu3 }
 0x15a   : > { %v1376_v57 = vadd.f32 %v2354_v5, %v1364_v27  ;;  %v1179_v58 = vadd.f32 %v1161_v55, %v1090_v54  ;;  %v1075_v28 = vpop.f32.mrf.mxu1 }
 0x15b   : > { %v1091_v6 = vadd.f32 %v1075_v28, %v1005_v62 }
 0x15c   : > { %v1384_v25 = vmax.f32 %v1376_v57, 0.0  ;;  %v1267_v61 = vadd.f32 %v1249_v2, %v1179_v58  ;;  %v1338_v30 = vpop.f32.mrf.mxu0 }
 0x15e   : > { %1392 = vst [vmem:[%s2360_s5 + $0x10] sm:$0xff] %v1384_v25  ;;  %v1353_v1 = vadd.f32 %v1335_v50, %v1267_v61 }
 0x160   : > { %v1365_v31 = vmul.f32 %v2349_v60, %v1353_v1 }
 0x161   : > { %v1164_v7 = vpop.f32.mrf.mxu2  ;;  %v1252_v10 = vpop.f32.mrf.mxu3 }
 0x162   : > { %v1377_v8 = vadd.f32 %v2354_v5, %v1365_v31  ;;  %v1180_v9 = vadd.f32 %v1164_v7, %v1091_v6  ;;  %v1078_v32 = vpop.f32.mrf.mxu1 }
 0x163   : > { %v1092_v17 = vadd.f32 %v1078_v32, %v1006_v34 }
 0x164   : > { %v1385_v29 = vmax.f32 %v1377_v8, 0.0  ;;  %v1268_v13 = vadd.f32 %v1252_v10, %v1180_v9  ;;  %v1341_v16 = vpop.f32.mrf.mxu0 }
 0x166   : > { %1393 = vst [vmem:[%s2360_s5 + $0x18] sm:$0xff] %v1385_v29  ;;  %v1354_v15 = vadd.f32 %v1338_v30, %v1268_v13 }
 0x168   : > { %v1366_v35 = vmul.f32 %v2349_v60, %v1354_v15 }
 0x169   : > { %v1167_v18 = vpop.f32.mrf.mxu2  ;;  %v1255_v3 = vpop.f32.mrf.mxu3 }
 0x16a   : > { %v1378_v20 = vadd.f32 %v2354_v5, %v1366_v35  ;;  %v1181_v22 = vadd.f32 %v1167_v18, %v1092_v17  ;;  %v1081_v36 = vpop.f32.mrf.mxu1 }
 0x16b   : > { %v1093_v47 = vadd.f32 %v1081_v36, %v1007_v23 }
 0x16c   : > { %v1386_v41 = vmax.f32 %v1378_v20, 0.0  ;;  %v1269_v38 = vadd.f32 %v1255_v3, %v1181_v22  ;;  %v1344_v4 = vpop.f32.mrf.mxu0 }
 0x16e   : > { %1394 = vst [vmem:[%s2360_s5 + $0x20] sm:$0xff] %v1386_v41  ;;  %v1355_v45 = vadd.f32 %v1341_v16, %v1269_v38 }
 0x170   : > { %v1367_v39 = vmul.f32 %v2349_v60, %v1355_v45 }
 0x171   : > { %v1170_v48 = vpop.f32.mrf.mxu2  ;;  %v1258_v40 = vpop.f32.mrf.mxu3 }
 0x172   : > { %v1379_v21 = vadd.f32 %v2354_v5, %v1367_v39  ;;  %v1182_v11 = vadd.f32 %v1170_v48, %v1093_v47  ;;  %v1084_v37 = vpop.f32.mrf.mxu1 }
 0x173   : > { %v1094_v51 = vadd.f32 %v1084_v37, %v1008_v44 }
 0x174   : > { %v1387_v26 = vmax.f32 %v1379_v21, 0.0  ;;  %v1270_v49 = vadd.f32 %v1258_v40, %v1182_v11  ;;  %v1347_v55 = vpop.f32.mrf.mxu0 }
 0x176   : > { %1395 = vst [vmem:[%s2360_s5 + $0x28] sm:$0xff] %v1387_v26  ;;  %v1356_v50 = vadd.f32 %v1344_v4, %v1270_v49 }
 0x178   : > { %v1368_v52 = vmul.f32 %v2349_v60, %v1356_v50 }
 0x179   : > { %v1173_v53 = vpop.f32.mrf.mxu2  ;;  %v1261_v27 = vpop.f32.mrf.mxu3 }
 0x17a   : > { %v1380_v46 = vadd.f32 %v2354_v5, %v1368_v52  ;;  %v1183_v54 = vadd.f32 %v1173_v53, %v1094_v51 }
 0x17c   : > { %v1388_v56 = vmax.f32 %v1380_v46, 0.0  ;;  %v1271_v57 = vadd.f32 %v1261_v27, %v1183_v54 }
 0x17e   : > { %1396 = vst [vmem:[%s2360_s5 + $0x30] sm:$0xff] %v1388_v56  ;;  %v1357_v42 = vadd.f32 %v1347_v55, %v1271_v57 }
 0x180   : > { %v1369_v58 = vmul.f32 %v2349_v60, %v1357_v42 }
 0x182   : > { %v1381_v2 = vadd.f32 %v2354_v5, %v1369_v58 }
 0x184   : > { %v1389_v28 = vmax.f32 %v1381_v2, 0.0 }
 0x186   : > { %1397 = vst [vmem:[%s2360_s5 + $0x38] sm:$0xff] %v1389_v28 }
 0x187   : > { %1811 = shalt.err (!%p1808_p7)
}
 0x188   : > { %s1864_s12 = smov 128   ;;  %s1865_s30 = smov 8  }
 0x189   : > { %1725 = dma.vmem_to_hbm [thread:$0]  (%p1930_p5), %s1415_s10, 1024, %s1417_s11, %s1399_s18, %s1864_s12, %s1864_s12, %s1865_s30  }
 0x18a PF: > { %s1431_s5 = sand.u32 1, %s1842_s15   ;;  %p1728_p8 = pnand %p1564_p10, %p1941_p9 }
 0x18b   : > { %s1432_s6 = scalar_lea.sflag [#allocation4], %s1431_s5 }
 0x18c   : > { %p1729_p11 = pneg %p1728_p8 }
 0x18e   : > { %1837 = dma.done.wait (%p1729_p11), %s1432_s6, 1024  }
 0x18f   : > { %1839 = vsyncadd (%p1729_p11), %s1432_s6, 4294966272  ;;  %s17_s20 = sadd.s32 1, %s1862_s20   ;;  %s2451_s15 = smov %s1846_s16 }
 0x190   : > { %p14_p12 = scmp.ge.s32.totalorder %s17_s20, 4   ;;  %s2452_s16 = smov %s1850_s17 }
 0x191   : > { %s2453_s17 = smov %s1939_s27  ;;  %s2454_s18 = smov %s1858_s19 }
 0x192   : > { %s2455_s19 = smov %s2457_s23  ;;  %16 = sbr.rel (!%p14_p12) target bundleno = 4 (0x4), region = 137 }
 0x197   :  { %1438 = vsyncpa [#allocation4], 1 }
 0x198   :  { %1440 = vsyncpa [#allocation4 + $0x1], 1 }

</bundles_post_ra>
